<compile_context>
chip_gen: v5e
topology: v5e:2x2
jax: 0.10.0
libtpu: 0.0.40
codegen_flags: <defaults>
</compile_context>

<pallas_src>
import jax
import jax.numpy as jnp
from jax.experimental import pallas as pl
from jax.experimental.pallas import tpu as pltpu


def _round_up(x, m):
    return ((x + m - 1) // m) * m


def iris_kernel(x_ref, w1t_ref, b1_ref, w2t_ref, b2_ref, o_ref):
    # x_ref  : (TB, 4)   natural PyTorch layout (batch on sublanes)
    # w1t_ref: (4, 10)   b1_ref: (1, 10)
    # w2t_ref: (10, 3)   b2_ref: (1, 3)
    # o_ref  : (TB, 3)
    x = x_ref[...]

    # fc1 + ReLU: (TB,4) @ (4,10) -> (TB,10), f32 accumulation.
    h = jnp.dot(x, w1t_ref[...], preferred_element_type=jnp.float32)
    h = jnp.maximum(h + b1_ref[...].astype(jnp.float32), 0.0)

    # fc2: (TB,10) @ (10,3) -> (TB,3)
    o = jnp.dot(h.astype(w2t_ref.dtype), w2t_ref[...],
                preferred_element_type=jnp.float32)
    o = o + b2_ref[...].astype(jnp.float32)

    o_ref[...] = o.astype(o_ref.dtype)


def iris_net(x, w1, b1, w2, b2, *, tb=16384):
    """Fused IrisNet forward (Pallas).

    x : (B, 4)               -- same layout as the PyTorch module
    w1: (10, 4), b1: (10,)   -- PyTorch nn.Linear(4, 10) layout
    w2: (3, 10), b2: (3,)    -- PyTorch nn.Linear(10, 3) layout
    Returns (B, 3) float32 logits.
    """
    B = x.shape[0]
    in_dim, hid = w1.shape[1], w1.shape[0]
    out_dim = w2.shape[0]

    # Batch tile: large by default (amortizes per-grid-step overhead), shrunk to a
    # single block for small batches; must be a multiple of 8 (sublane granularity).
    # Cap at 16K: natural-layout tiles lane-pad 4->128, so double-buffered x+out is
    # ~2 KiB/sample -> ~32 MiB at tb=16384, safe even on v7x's 64 MiB VMEM.
    tb = int(min(tb, _round_up(B, 8)))
    tb = min(_round_up(tb, 8), 16384)

    n_blocks = pl.cdiv(B, tb)
    Bp = n_blocks * tb
    # Pad the batch only when the tile doesn't divide it (no transpose; when it
    # divides, x is passed straight through untouched).
    x_in = x if Bp == B else jnp.pad(x, ((0, Bp - B), (0, 0)))

    # Tiny weight transposes (40 / 30 elements) so the kernel uses plain A @ B.
    w1t = w1.T                      # (4, 10)
    w2t = w2.T                      # (10, 3)
    b1r = b1.reshape(1, hid)
    b2r = b2.reshape(1, out_dim)

    # Scoped-VMEM budget: 2 double-buffered, lane-padded (tb,*) f32 slabs.
    vmem_limit = min(48 << 20, max(32 << 20, 2 * 2 * 512 * tb + (6 << 20)))

    out = pl.pallas_call(
        iris_kernel,
        out_shape=jax.ShapeDtypeStruct((Bp, out_dim), jnp.float32),
        grid=(n_blocks,),
        in_specs=[
            # Streamed, double-buffered batch tiles of x (natural layout).
            pl.BlockSpec((tb, in_dim), lambda i: (i, 0)),
            # Weights / biases: constant index maps -> fetched once, VMEM-resident.
            pl.BlockSpec((in_dim, hid), lambda i: (0, 0)),
            pl.BlockSpec((1, hid), lambda i: (0, 0)),
            pl.BlockSpec((hid, out_dim), lambda i: (0, 0)),
            pl.BlockSpec((1, out_dim), lambda i: (0, 0)),
        ],
        out_specs=pl.BlockSpec((tb, out_dim), lambda i: (i, 0)),
        compiler_params=pltpu.CompilerParams(
            # Independent batch tiles: shard across both TensorCores on v7x.
            dimension_semantics=("parallel",),
            vmem_limit_bytes=int(vmem_limit),
        ),
        cost_estimate=pl.CostEstimate(
            flops=2 * B * (in_dim * hid + hid * out_dim),
            bytes_accessed=4 * (B * (in_dim + out_dim)
                                + hid * in_dim + hid + out_dim * hid + out_dim),
            transcendentals=0,
        ),
    )(x_in, w1t, b1r, w2t, b2r)

    return out if Bp == B else out[:B]


def iris_net_xla(x, w1, b1, w2, b2):
    # Plain fused-XLA reference (also the small-batch fast path).
    return jnp.maximum(x @ w1.T + b1, 0.0) @ w2.T + b2


def iris_net_auto(x, w1, b1, w2, b2, *, tb=16384, xla_threshold=4096):
    # For tiny batches the fixed pallas_call launch overhead exceeds one fused XLA
    # matmul chain; dispatch accordingly.
    if x.shape[0] <= xla_threshold:
        return iris_net_xla(x, w1, b1, w2, b2)
    return iris_net(x, w1, b1, w2, b2, tb=tb)


def init_params(key):
    # Deterministic synthetic init mirroring nn.Linear's uniform(-1/sqrt(fan_in), +),
    # stored in PyTorch's native (out_features, in_features) layout.
    k1, k2, k3, k4 = jax.random.split(key, 4)
    lim1 = 1.0 / jnp.sqrt(4.0)
    lim2 = 1.0 / jnp.sqrt(10.0)
    w1 = jax.random.uniform(k1, (10, 4), jnp.float32, -lim1, lim1)
    b1 = jax.random.uniform(k2, (10,), jnp.float32, -lim1, lim1)
    w2 = jax.random.uniform(k3, (3, 10), jnp.float32, -lim2, lim2)
    b2 = jax.random.uniform(k4, (3,), jnp.float32, -lim2, lim2)
    return w1, b1, w2, b2


if __name__ == "__main__":
    key = jax.random.PRNGKey(0)
    pkey, xkey1, xkey2, xkey3 = jax.random.split(key, 4)
    w1, b1, w2, b2 = init_params(pkey)

    # 1) Small Iris-style batch: 8 samples, 4 features (single block, tb shrinks to 8).
    #    Call the Pallas path directly so the kernel itself is exercised.
    x_small = jax.random.normal(xkey1, (8, 4), jnp.float32)
    out_small = jax.block_until_ready(iris_net(x_small, w1, b1, w2, b2))
    ref_small = iris_net_xla(x_small, w1, b1, w2, b2)
    assert out_small.shape == (8, 3)
    assert jnp.allclose(out_small, ref_small, atol=1e-5, rtol=1e-5), "small-batch mismatch"

    # 2) Multi-block batch, tile divides B exactly (no pad path at all).
    x_even = jax.random.normal(xkey2, (384, 4), jnp.float32)
    out_even = jax.block_until_ready(iris_net(x_even, w1, b1, w2, b2, tb=128))
    ref_even = iris_net_xla(x_even, w1, b1, w2, b2)
    assert out_even.shape == (384, 3)
    assert jnp.allclose(out_even, ref_even, atol=1e-5, rtol=1e-5), "even multi-block mismatch"

    # 3) Ragged batch (tile does not divide B) exercising the conditional pad path.
    x_big = jax.random.normal(xkey3, (300, 4), jnp.float32)
    out_big = jax.block_until_ready(iris_net(x_big, w1, b1, w2, b2, tb=128))
    ref_big = iris_net_xla(x_big, w1, b1, w2, b2)
    assert out_big.shape == (300, 3)
    assert jnp.allclose(out_big, ref_big, atol=1e-5, rtol=1e-5), "ragged multi-block mismatch"

    print("KERNEL_OK")
</pallas_src>

<mosaic_0001>
module attributes {stable_mosaic.version = 11 : i64} {
  func.func @iris_kernel(%arg0: i32, %arg1: memref<8x4xf32, #tpu.memory_space<vmem>>, %arg2: memref<4x10xf32, #tpu.memory_space<vmem>>, %arg3: memref<1x10xf32, #tpu.memory_space<vmem>>, %arg4: memref<10x3xf32, #tpu.memory_space<vmem>>, %arg5: memref<1x3xf32, #tpu.memory_space<vmem>>, %arg6: memref<8x3xf32, #tpu.memory_space<vmem>>) attributes {dimension_semantics = [#tpu.dimension_semantics<parallel>], iteration_bounds = array<i64: 1>, scalar_prefetch = 0 : i64, scratch_operands = 0 : i64, tpu.core_type = #tpu.core_type<tc>, window_params = [{transform_indices = @transform_0, window_bounds = array<i64: 8, 4>}, {pipeline_mode = #tpu.pipeline_mode<synchronous>, transform_indices = @transform_1, window_bounds = array<i64: 4, 10>}, {pipeline_mode = #tpu.pipeline_mode<synchronous>, transform_indices = @transform_2, window_bounds = array<i64: 1, 10>}, {pipeline_mode = #tpu.pipeline_mode<synchronous>, transform_indices = @transform_3, window_bounds = array<i64: 10, 3>}, {pipeline_mode = #tpu.pipeline_mode<synchronous>, transform_indices = @transform_4, window_bounds = array<i64: 1, 3>}, {transform_indices = @transform_5, window_bounds = array<i64: 8, 3>}]} {
    %c0 = arith.constant 0 : index
    %c0_0 = arith.constant 0 : index
    %0 = vector.load %arg1[%c0, %c0_0] : memref<8x4xf32, #tpu.memory_space<vmem>>, vector<8x4xf32>
    %c0_1 = arith.constant 0 : index
    %c0_2 = arith.constant 0 : index
    %1 = vector.load %arg2[%c0_1, %c0_2] : memref<4x10xf32, #tpu.memory_space<vmem>>, vector<4x10xf32>
    %cst = arith.constant dense<0.000000e+00> : vector<8x10xf32>
    %2 = tpu.matmul %0, %1, %cst {dimension_numbers = #tpu.dot_dimension_numbers<[1], [0], [0], [1], [0, 0, 1, 1], [], []>} : vector<8x4xf32>, vector<4x10xf32>, vector<8x10xf32> -> vector<8x10xf32>
    %c0_3 = arith.constant 0 : index
    %c0_4 = arith.constant 0 : index
    %3 = vector.load %arg3[%c0_3, %c0_4] : memref<1x10xf32, #tpu.memory_space<vmem>>, vector<1x10xf32>
    %4 = vector.broadcast %3 : vector<1x10xf32> to vector<8x10xf32>
    %5 = arith.addf %2, %4 : vector<8x10xf32>
    %cst_5 = arith.constant 0.000000e+00 : f32
    %6 = vector.broadcast %cst_5 : f32 to vector<8x10xf32>
    %7 = arith.maximumf %5, %6 : vector<8x10xf32>
    %c0_6 = arith.constant 0 : index
    %c0_7 = arith.constant 0 : index
    %8 = vector.load %arg4[%c0_6, %c0_7] : memref<10x3xf32, #tpu.memory_space<vmem>>, vector<10x3xf32>
    %cst_8 = arith.constant dense<0.000000e+00> : vector<8x3xf32>
    %9 = tpu.matmul %7, %8, %cst_8 {dimension_numbers = #tpu.dot_dimension_numbers<[1], [0], [0], [1], [0, 0, 1, 1], [], []>} : vector<8x10xf32>, vector<10x3xf32>, vector<8x3xf32> -> vector<8x3xf32>
    %c0_9 = arith.constant 0 : index
    %c0_10 = arith.constant 0 : index
    %10 = vector.load %arg5[%c0_9, %c0_10] : memref<1x3xf32, #tpu.memory_space<vmem>>, vector<1x3xf32>
    %11 = vector.broadcast %10 : vector<1x3xf32> to vector<8x3xf32>
    %12 = arith.addf %9, %11 : vector<8x3xf32>
    %c0_11 = arith.constant 0 : index
    %c0_12 = arith.constant 0 : index
    %13 = vector.load %arg6[%c0_11, %c0_12] : memref<8x3xf32, #tpu.memory_space<vmem>>, vector<8x3xf32>
    tpu.vector_store %arg6[%c0_11, %c0_12], %12 {strides = array<i32>} : memref<8x3xf32, #tpu.memory_space<vmem>>, vector<8x3xf32>,
    return
  }
  func.func @transform_0(%arg0: i32) -> (i32, i32) {
    %c0_i32 = arith.constant 0 : i32
    %c0_i32_0 = arith.constant 0 : i32
    return %arg0, %c0_i32 : i32, i32
  }
  func.func @transform_1(%arg0: i32) -> (i32, i32) {
    %c0_i32 = arith.constant 0 : i32
    %c0_i32_0 = arith.constant 0 : i32
    %c0_i32_1 = arith.constant 0 : i32
    return %c0_i32, %c0_i32_0 : i32, i32
  }
  func.func @transform_2(%arg0: i32) -> (i32, i32) {
    %c0_i32 = arith.constant 0 : i32
    %c0_i32_0 = arith.constant 0 : i32
    %c0_i32_1 = arith.constant 0 : i32
    return %c0_i32, %c0_i32_0 : i32, i32
  }
  func.func @transform_3(%arg0: i32) -> (i32, i32) {
    %c0_i32 = arith.constant 0 : i32
    %c0_i32_0 = arith.constant 0 : i32
    %c0_i32_1 = arith.constant 0 : i32
    return %c0_i32, %c0_i32_0 : i32, i32
  }
  func.func @transform_4(%arg0: i32) -> (i32, i32) {
    %c0_i32 = arith.constant 0 : i32
    %c0_i32_0 = arith.constant 0 : i32
    %c0_i32_1 = arith.constant 0 : i32
    return %c0_i32, %c0_i32_0 : i32, i32
  }
  func.func @transform_5(%arg0: i32) -> (i32, i32) {
    %c0_i32 = arith.constant 0 : i32
    %c0_i32_0 = arith.constant 0 : i32
    return %arg0, %c0_i32 : i32, i32
  }
}

</mosaic_0001>

<bundles_post_ra>
// kernel: tpu_custom_call.1
= control target key start
LH: loop header
LB: loop body
LE: loop exit
PB: predicated region body
PF: predicated region fallthrough
CT: control target
= control target key end

     0   :  { %vm30_vm0 = vcmask 1043456   ;;  %vm26_vm1 = vcmask 31744   ;;  %vm65_vm2 = vcmask 1041408   ;;  %vm61_vm3 = vcmask 80896   ;;  %s152_s1 = inlined_call_operand.vmem [shape: f32[4,10], index: 1, kind: input, shape index: {}]   ;;  %s153_s0 = inlined_call_operand.vmem [shape: f32[8,4], index: 0, kind: input, shape index: {}]   ;;  %s154_s2 = inlined_call_operand.vmem [shape: f32[1,10], index: 2, kind: input, shape index: {}]   ;;  %s155_s4 = inlined_call_operand.vmem [shape: f32[1,3], index: 4, kind: input, shape index: {}]   ;;  %s156_s3 = inlined_call_operand.vmem [shape: f32[10,3], index: 3, kind: input, shape index: {}]   ;;  %s157_s5 = inlined_call_operand.vmem [shape: f32[8,3], index: 5, kind: output, shape index: {}]  }
   0x1   :  { %v21_v0 = vld [vmem:[%s152_s1] sm:$0xf]  ;;  %v56_v2 = vld [vmem:[%s156_s3 + $0x8] sm:$0x3]  ;;  %vm89_vm4 = vcmask 23552  }
   0x2   :  { %v20_v1 = vld [vmem:[%s153_s0] sm:$0xff]  ;;  %95 = vmatpush.msk.msra.mxu0 %vm30_vm0, %v21_v0  ;;  %97 = vmatpush.msk.msra.mxu1 %vm65_vm2, %v56_v2 }
   0x3   :  { %96 = vmatmul.msk.f32.vlgmr.msra.gmra.mxu0 %vm26_vm1, %v20_v1  ;;  %v55_v3 = vld [vmem:[%s156_s3] sm:$0xff] }
   0x4   :  { %84 = vmatpush.msra.mxu1 %v55_v3  ;;  %v99_v4 = vld [vmem:[%s154_s2] ss:$0 sm:$0xff] }
   0x5   :  { %v100_v8 = vld [vmem:[%s155_s4] ss:$0 sm:$0xff] }
  0x80   :  { %v51_v5 = vpop.f32.mrf.mxu0 }
  0x81   :  { %v52_v6 = vadd.f32 %v99_v4, %v51_v5 }
  0x83   :  { %v54_v7 = vmax.f32 %v52_v6, 0.0 }
  0x85   :  { %98 = vmatmul.msk.f32.vlgmr.msra.gmra.mxu1 %vm61_vm3, %v54_v7 }
 0x102   :  { %v86_v9 = vpop.f32.mrf.mxu1 }
 0x103   :  { %v87_v10 = vadd.f32 %v100_v8, %v86_v9 }
 0x105   :  { %90 = vst.msk [vmem:[%s157_s5] sm:$0xff] %vm89_vm4, %v87_v10 }

</bundles_post_ra>
